<compile_context>
chip_gen: v7x
topology: tpu7x:2x2x1
jax: 0.10.0
libtpu: 0.0.40
codegen_flags: <defaults>
</compile_context>

<pallas_src>
import jax
import jax.numpy as jnp
from jax.experimental import pallas as pl
from jax.experimental.pallas import tpu as pltpu


def _linear_kernel(wb_ref, xT_ref, o_ref):
    # wb_ref: SMEM (3,)  = [w0, w1, b]    (scalar prefetch)
    # xT_ref: VMEM (2, TB) block of x^T   (features x batch-tile, lane-dense)
    # o_ref : VMEM (1, TB) block of y^T
    w0 = wb_ref[0]
    w1 = wb_ref[1]
    b = wb_ref[2]
    # y = w0*x0 + w1*x1 + b  -- pure VPU elementwise over full 128-lane vregs.
    o_ref[...] = xT_ref[0:1, :] * w0 + xT_ref[1:2, :] * w1 + b


def svm_forward(x, weight, bias, *, tb=512):
    """y = x @ W^T + b  (forward of nn.Linear(2, 1)).

    x: (B, 2) f32, weight: (1, 2) f32, bias: (1,) f32 -> (B, 1) f32.
    `tb` is the batch tile (multiple of 128); raise it to 8192-32768 for very
    large B (still well under v7x's 64 MiB VMEM when double-buffered).
    Note: for tiny B (a handful of rows) the ~0.35us/step launch overhead
    dominates regardless -- this kernel is aimed at large-batch inference.
    """
    B, F = x.shape
    O = weight.shape[0]
    assert F == 2 and O == 1

    # Pack the 3 parameters for SMEM scalar-prefetch.
    wb = jnp.concatenate(
        [weight.reshape(-1), bias.reshape(-1)]).astype(jnp.float32)

    # Lane-dense layout: (F, B) with batch on the 128-lane axis; pad batch up
    # to a multiple of the tile (padding is sliced off afterwards).
    bp = pl.cdiv(B, tb) * tb
    xT = jnp.pad(x.astype(jnp.float32).T, ((0, 0), (0, bp - B)))

    yT = pl.pallas_call(
        _linear_kernel,
        out_shape=jax.ShapeDtypeStruct((O, bp), jnp.float32),
        grid_spec=pltpu.PrefetchScalarGridSpec(
            num_scalar_prefetch=1,
            grid=(bp // tb,),
            in_specs=[pl.BlockSpec((F, tb), lambda i, wb_ref: (0, i))],
            out_specs=pl.BlockSpec((O, tb), lambda i, wb_ref: (0, i)),
        ),
        compiler_params=pltpu.CompilerParams(
            dimension_semantics=("parallel",)),
    )(wb, xT)

    return yT[:, :B].T.astype(x.dtype)   # (B, 1)


if __name__ == "__main__":
    key = jax.random.PRNGKey(0)
    kx, kw, kb, kx2 = jax.random.split(key, 4)

    IN, OUT = 2, 1
    # Deterministic PyTorch-style U(-1/sqrt(in), 1/sqrt(in)) parameter init.
    bound = 1.0 / jnp.sqrt(jnp.float32(IN))
    weight = jax.random.uniform(kw, (OUT, IN), jnp.float32, -bound, bound)
    bias = jax.random.uniform(kb, (OUT,), jnp.float32, -bound, bound)

    ok = True
    # Small batch (module-level smoke test) and a multi-tile batch (grid > 1).
    for B, k in ((8, kx), (2048, kx2)):
        x = jax.random.normal(k, (B, IN), dtype=jnp.float32)
        y = svm_forward(x, weight, bias)
        jax.block_until_ready(y)
        y_ref = x @ weight.T + bias           # reference: nn.Linear semantics
        ok = ok and (y.shape == (B, OUT))
        ok = ok and bool(jnp.allclose(y, y_ref, atol=1e-6, rtol=1e-6))

    assert ok
    print("KERNEL_OK")
</pallas_src>

<mosaic_0001>
module attributes {stable_mosaic.version = 11 : i64} {
  func.func @_linear_kernel(%arg0: i32, %arg1: memref<3xf32, #tpu.memory_space<smem>>, %arg2: memref<2x512xf32, #tpu.memory_space<vmem>>, %arg3: memref<1x512xf32, #tpu.memory_space<vmem>>) attributes {dimension_semantics = [#tpu.dimension_semantics<parallel>], iteration_bounds = array<i64: 1>, scalar_prefetch = 1 : i64, scratch_operands = 0 : i64, tpu.core_type = #tpu.core_type<tc>, window_params = [{transform_indices = @transform_0, window_bounds = array<i64: 2, 512>}, {transform_indices = @transform_1, window_bounds = array<i64: 1, 512>}]} {
    %c0 = arith.constant 0 : index
    %0 = memref.load %arg1[%c0] : memref<3xf32, #tpu.memory_space<smem>>
    %c1 = arith.constant 1 : index
    %1 = memref.load %arg1[%c1] : memref<3xf32, #tpu.memory_space<smem>>
    %c2 = arith.constant 2 : index
    %2 = memref.load %arg1[%c2] : memref<3xf32, #tpu.memory_space<smem>>
    %c0_0 = arith.constant 0 : index
    %c0_1 = arith.constant 0 : index
    %3 = vector.load %arg2[%c0_0, %c0_1] : memref<2x512xf32, #tpu.memory_space<vmem>>, vector<1x512xf32>
    %4 = vector.broadcast %0 : f32 to vector<1x512xf32>
    %5 = arith.mulf %3, %4 : vector<1x512xf32>
    %c1_2 = arith.constant 1 : index
    %c0_3 = arith.constant 0 : index
    %6 = vector.load %arg2[%c1_2, %c0_3] : memref<2x512xf32, #tpu.memory_space<vmem>>, vector<1x512xf32>
    %7 = vector.broadcast %1 : f32 to vector<1x512xf32>
    %8 = arith.mulf %6, %7 : vector<1x512xf32>
    %9 = arith.addf %5, %8 : vector<1x512xf32>
    %10 = vector.broadcast %2 : f32 to vector<1x512xf32>
    %11 = arith.addf %9, %10 : vector<1x512xf32>
    %c0_4 = arith.constant 0 : index
    %c0_5 = arith.constant 0 : index
    %12 = vector.load %arg3[%c0_4, %c0_5] : memref<1x512xf32, #tpu.memory_space<vmem>>, vector<1x512xf32>
    tpu.vector_store %arg3[%c0_4, %c0_5], %11 {strides = array<i32>} : memref<1x512xf32, #tpu.memory_space<vmem>>, vector<1x512xf32>,
    return
  }
  func.func @transform_0(%arg0: i32, %arg1: memref<3xf32, #tpu.memory_space<smem>>) -> (i32, i32) {
    %c0_i32 = arith.constant 0 : i32
    %c0_i32_0 = arith.constant 0 : i32
    return %c0_i32, %arg0 : i32, i32
  }
  func.func @transform_1(%arg0: i32, %arg1: memref<3xf32, #tpu.memory_space<smem>>) -> (i32, i32) {
    %c0_i32 = arith.constant 0 : i32
    %c0_i32_0 = arith.constant 0 : i32
    return %c0_i32, %arg0 : i32, i32
  }
}

</mosaic_0001>

<bundles_post_ra>
// kernel: tpu_custom_call.1
= control target key start
LH: loop header
LB: loop body
LE: loop exit
PB: predicated region body
PF: predicated region fallthrough
CT: control target
= control target key end

     0   :  { %s178_s0 = inlined_call_operand.hbm [shape: f32[3], index: 0, kind: input, shape index: {}]   ;;  %s179_s1 = inlined_call_operand.hbm [shape: f32[2,512], index: 1, kind: input, shape index: {}]   ;;  %s180_s2 = inlined_call_operand.hbm [shape: f32[1,512], index: 2, kind: output, shape index: {}]  }
   0x1   :  { %s64_s11 = scalar_lea.hbm %s178_s0, 16 }
   0x2   :  { %p65_p0 = scmp.ne.s32.totalorder %s178_s0, %s64_s11  ;;  %p68_p1 = scmp.lt.u32.totalorder %s64_s11, %s178_s0 }
   0x4   :  { %p70_p2 = pnand %p68_p1, %p65_p0 }
   0x6   :  { %73 = shalt.err (!%p70_p2)  }
   0x7   :  { %s124_s16 = smov [#allocation3]  }
   0x8   :  { %8 = dma.hbm_to_smem %s178_s0, 16, %s124_s16, [#allocation2] }
   0x9   :  { %118 = dma.done.wait [#allocation2], 16 }
   0xa   :  { %119 = vsyncadd [#allocation2], 4294967280 }
   0xb   :  { %10 = sfence }
   0xc   :  { %11 = vsyncpa [#allocation5], 0 }
   0xd   :  { %12 = vsyncpa [#allocation6], 0  ;;  %s125_s19 = smov [#allocation4]   ;;  %s74_s23 = scalar_lea.hbm %s179_s1, 128 }
   0xe   :  { %s19_s20 = sshll.u32 %s125_s19, 4  ;;  %p75_p3 = scmp.ne.s32.totalorder %s179_s1, %s74_s23  ;;  %s20_s20 = int_to_ptr.vmem [resolvable:$true] %s19_s20 }
   0xf   :  { %p78_p4 = scmp.lt.u32.totalorder %s74_s23, %s179_s1 }
  0x11   :  { %p80_p5 = pnand %p78_p4, %p75_p3 }
  0x13   :  { %83 = shalt.err (!%p80_p5)
}
  0x14   :  { %s84_s0 = scalar_lea.vmem %s20_s20, 128  ;;  %p89_p7 = scmp.lt.s32.totalorder %s20_s20, %s20_s20 }
  0x15   :  { %p85_p6 = scmp.ne.s32.totalorder %s20_s20, %s84_s0  ;;  %p90_p8 = scmp.lt.s32.totalorder %s84_s0, %s84_s0 }
  0x17   :  { %p91_p9 = por %p90_p8, %p89_p7 }
  0x19   :  { %p92_p10 = pnand %p91_p9, %p85_p6 }
  0x1b   :  { %95 = shalt.err (!%p92_p10)
}
  0x1c   :  { %22 = dma.hbm_to_vmem [thread:$0]  %s179_s1, 128, %s20_s20, [#allocation5]  }
  0x1d   :  { %120 = dma.done.wait [#allocation5], 128  }
  0x1e   :  { %121 = vsyncadd [#allocation5], 4294967168  ;;  %s26_s30 = sld [smem:[#allocation3]]  ;;  %s59_s3 = sld [smem:[#allocation3 + $0x1]]  ;;  %v39_v4 = vlaneseq }
  0x1f   :  { %s60_s4 = sld [smem:[#allocation3 + $0x2]]  ;;  %v29_v0 = vld [vmem:[#allocation4] ss:$2 sm:$0xf]  ;;  %s126_s5 = smov [#allocation7]  }
  0x20   :  { %v33_v2 = vld [vmem:[#allocation4 + $0x1] ss:$2 sm:$0xf]  ;;  %s50_s6 = sshll.u32 %s126_s5, 4  ;;  %vm41_vm0 = vcmp.lt.s32.totalorder %v39_v4, 512  ;;  %s51_s6 = int_to_ptr.vmem [resolvable:$true] %s50_s6 }
  0x21   :  { %s96_s1 = scalar_lea.vmem %s51_s6, 64  ;;  %p101_p12 = scmp.lt.s32.totalorder %s51_s6, %s51_s6 }
  0x22   :  { %p97_p11 = scmp.ne.s32.totalorder %s51_s6, %s96_s1  ;;  %p102_p13 = scmp.lt.s32.totalorder %s96_s1, %s96_s1 }
  0x24   :  { %v30_v1 = vstv %s26_s30  ;;  %v34_v3 = vstv %s59_s3  ;;  %p103_p0 = por %p102_p13, %p101_p12 }
  0x25   :  { %v31_v5 = vmul.f32 %v30_v1, %v29_v0  ;;  %v35_v6 = vmul.f32 %v34_v3, %v33_v2  ;;  %v37_v7 = vstv %s60_s4 }
  0x26   :  { %p104_p1 = pnand %p103_p0, %p97_p11 }
  0x27   :  { %v36_v8 = vadd.f32 %v35_v6, %v31_v5 }
  0x29   :  { %v38_v9 = vadd.f32 %v37_v7, %v36_v8 }
  0x2b   :  { %43 = vst.msk [vmem:[#allocation7] sm:$0xf] %vm41_vm0, %v38_v9 }
  0x2c   :  { %107 = shalt.err (!%p104_p1)
}
  0x2d   :  { %s108_s9 = scalar_lea.hbm %s180_s2, 64 }
  0x2e   :  { %p109_p2 = scmp.ne.s32.totalorder %s180_s2, %s108_s9  ;;  %p112_p3 = scmp.lt.u32.totalorder %s108_s9, %s180_s2 }
  0x30   :  { %p114_p4 = pnand %p112_p3, %p109_p2 }
  0x32   :  { %117 = shalt.err (!%p114_p4)
}
  0x33   :  { %53 = dma.vmem_to_hbm [thread:$0]  %s51_s6, 64, %s180_s2, [#allocation6]  }
  0x34   :  { %122 = dma.done.wait [#allocation6], 64  }
  0x35   :  { %123 = vsyncadd [#allocation6], 4294967232 }
  0x36   :  { %57 = vsyncpa [#allocation5], 1 }
  0x37   :  { %58 = vsyncpa [#allocation6], 1 }

</bundles_post_ra>
